<compile_context>
chip_gen: v7x
topology: tpu7x:2x2x1
jax: 0.10.0
libtpu: 0.0.40
codegen_flags: <defaults>
</compile_context>

<pallas_src>
import functools
import math

import jax
import jax.numpy as jnp
from jax.experimental import pallas as pl
from jax.experimental.pallas import tpu as pltpu

_BF16 = jnp.bfloat16


# ---------------------------------------------------------------------------
# Small helpers
# ---------------------------------------------------------------------------

def _pick_tile(n, target, align=8):
    """Largest divisor of n that is <= target and a multiple of `align`.
    Falls back to the full extent (always legal)."""
    target = min(target, n)
    for t in range(target, align - 1, -1):
        if n % t == 0 and t % align == 0:
            return t
    # TODO(synk): pad n up to the tile size (and mask) instead of a single-step grid.
    return n


def _layernorm_f32(x, gamma, beta, eps):
    # x: (TM, D) f32; gamma/beta: (1, D) f32
    mu = jnp.mean(x, axis=-1, keepdims=True)
    xc = x - mu
    var = jnp.mean(xc * xc, axis=-1, keepdims=True)
    return xc * jax.lax.rsqrt(var + eps) * gamma + beta


def _gelu_tanh(x):
    # tanh-approximate GELU (used in both kernel and reference).
    # TODO(synk): torch F.gelu defaults to the exact erf form (~1e-3 difference).
    c = math.sqrt(2.0 / math.pi)
    return 0.5 * x * (1.0 + jnp.tanh(c * (x + 0.044715 * x * x * x)))


_VMEM_LIMIT_CACHE = [None]


def _vmem_limit_bytes():
    """Per-generation scoped-VMEM limit (<=100 MiB on 128 MiB chips, <=56 MiB on v7x)."""
    if _VMEM_LIMIT_CACHE[0] is None:
        try:
            cap = int(pltpu.get_tpu_info().vmem_capacity_bytes)
        except Exception:
            cap = 64 * 1024 * 1024
        _VMEM_LIMIT_CACHE[0] = int(min(int(cap * 0.85), 100 * 1024 * 1024))
    return _VMEM_LIMIT_CACHE[0]


def _cparams(sems):
    return pltpu.CompilerParams(dimension_semantics=sems,
                                vmem_limit_bytes=_vmem_limit_bytes())


# --- pl.Buffered(1) feature probe: single-buffer constant-index weight operands ----
_BUF1_OK = [None]


def _buffered1_supported():
    if _BUF1_OK[0] is None:
        try:
            spec = pl.BlockSpec((8, 128), lambda i: (0, 0), pipeline_mode=pl.Buffered(1))

            def _k(x_ref, o_ref):
                o_ref[...] = x_ref[...] * 2.0

            out = pl.pallas_call(
                _k,
                out_shape=jax.ShapeDtypeStruct((8, 128), jnp.float32),
                grid=(2,),
                in_specs=[spec],
                out_specs=pl.BlockSpec((8, 128), lambda i: (0, 0)),
            )(jnp.ones((8, 128), jnp.float32))
            jax.block_until_ready(out)
            _BUF1_OK[0] = True
        except Exception:
            _BUF1_OK[0] = False
    return _BUF1_OK[0]


def _const_spec(block_shape, index_map):
    """BlockSpec for an operand whose block index never changes: single-buffer it."""
    if _buffered1_supported():
        return pl.BlockSpec(block_shape, index_map, pipeline_mode=pl.Buffered(1))
    return pl.BlockSpec(block_shape, index_map)


# ---------------------------------------------------------------------------
# Pallas kernels
# ---------------------------------------------------------------------------

def _linear_bias_kernel(x_ref, w_ref, b_ref, o_ref):
    # x: (TM, K) f32, w: (K, E) bf16, b: (1, E) f32 -> o: (TM, E) f32
    acc = jnp.dot(x_ref[...].astype(_BF16), w_ref[...],
                  preferred_element_type=jnp.float32)
    o_ref[...] = (acc + b_ref[...]).astype(o_ref.dtype)


def _ln_qkv_kernel(x_ref, g_ref, b_ref, w_ref, o_ref, *, eps):
    # Fused LayerNorm (f32, recomputed per head-column block - cheap VPU work) +
    # one (TM, D) x (D, C) head-column projection (bf16 MXU, f32 accumulate).
    xn = _layernorm_f32(x_ref[...].astype(jnp.float32), g_ref[...], b_ref[...], eps)
    o_ref[0] = jnp.dot(xn.astype(_BF16), w_ref[0],
                       preferred_element_type=jnp.float32).astype(o_ref.dtype)


def _flash_attn_kernel(q_ref, k_ref, v_ref, o_ref, m_sc, l_sc, acc_sc):
    # Head-major blocks: q (1,1,TQ,C), k/v (1,1,TKV,C) bf16. Online softmax over the
    # KV grid axis; softmax scale already folded into w_q.
    kv_i = pl.program_id(3)

    @pl.when(kv_i == 0)
    def _init():
        m_sc[...] = jnp.full(m_sc.shape, -jnp.inf, dtype=m_sc.dtype)
        l_sc[...] = jnp.zeros(l_sc.shape, dtype=l_sc.dtype)
        acc_sc[...] = jnp.zeros(acc_sc.shape, dtype=acc_sc.dtype)

    q = q_ref[0, 0]          # (TQ, C)
    k = k_ref[0, 0]          # (TKV, C)
    v = v_ref[0, 0]          # (TKV, C)

    # contract last dims directly: no explicit k.T
    s = jax.lax.dot_general(q, k, (((1,), (1,)), ((), ())),
                            preferred_element_type=jnp.float32)      # (TQ, TKV) f32
    m_prev = m_sc[...]                                               # (TQ, 1)
    m_new = jnp.maximum(m_prev, jnp.max(s, axis=-1, keepdims=True))
    alpha = jnp.exp(m_prev - m_new)
    p = jnp.exp(s - m_new)
    l_sc[...] = alpha * l_sc[...] + jnp.sum(p, axis=-1, keepdims=True)
    acc_sc[...] = alpha * acc_sc[...] + jnp.dot(
        p.astype(v.dtype), v, preferred_element_type=jnp.float32)
    m_sc[...] = m_new

    @pl.when(kv_i == pl.num_programs(3) - 1)
    def _finalize():
        o_ref[0, 0] = (acc_sc[...] *
                       pl.reciprocal(l_sc[...], approx=True)).astype(o_ref.dtype)


def _epilogue_kernel(gates_ref, attn_ref, x_ref, wo_ref, bo_ref, g2_ref, bt2_ref,
                     w1a_ref, b1a_ref, w1g_ref, b1g_ref, w2_ref, b2_ref,
                     o_ref, y_sc, xn_sc, acc_sc, *, heads, eps):
    # Fully fused: out = y + tanh(a_dense) * (GEGLU(LN2(y)) @ w2 + b2),
    #   where y = x + tanh(a_attn) * (attn @ w_o + b_o),
    # with the FF hidden dimension blocked on grid axis 2 (f32 accumulator in VMEM).
    j = pl.program_id(2)

    @pl.when(j == 0)
    def _init():
        # attn @ w_o as a sum of per-head (TM,C)x(C,D) matmuls (head-major layout).
        proj = jnp.dot(attn_ref[0, 0], wo_ref[0], preferred_element_type=jnp.float32)
        for h in range(1, heads):
            proj = proj + jnp.dot(attn_ref[0, h], wo_ref[h],
                                  preferred_element_type=jnp.float32)
        gate_a = gates_ref[0]
        y = x_ref[0].astype(jnp.float32) + gate_a * (proj + bo_ref[...])
        y_sc[...] = y
        xn_sc[...] = _layernorm_f32(y, g2_ref[...], bt2_ref[...], eps).astype(_BF16)
        acc_sc[...] = jnp.zeros(acc_sc.shape, dtype=acc_sc.dtype)

    xn = xn_sc[...]                                                   # (TM, D) bf16
    a = jnp.dot(xn, w1a_ref[...], preferred_element_type=jnp.float32) + b1a_ref[...]
    g = jnp.dot(xn, w1g_ref[...], preferred_element_type=jnp.float32) + b1g_ref[...]
    u = a * _gelu_tanh(g)                                             # (TM, DF_BLK)
    acc_sc[...] += jnp.dot(u.astype(_BF16), w2_ref[...],
                           preferred_element_type=jnp.float32)

    @pl.when(j == pl.num_programs(2) - 1)
    def _finalize():
        gate_d = gates_ref[1]
        o_ref[0] = (y_sc[...] + gate_d * (acc_sc[...] + b2_ref[...])).astype(o_ref.dtype)


# ---------------------------------------------------------------------------
# pallas_call wrappers (tiling / grids)
# ---------------------------------------------------------------------------

def pallas_linear(x, w, b, tm_target=512):
    M, K = x.shape
    E = w.shape[1]
    tm = _pick_tile(M, tm_target)
    return pl.pallas_call(
        _linear_bias_kernel,
        out_shape=jax.ShapeDtypeStruct((M, E), jnp.float32),
        grid=(M // tm,),
        in_specs=[pl.BlockSpec((tm, K), lambda i: (i, 0)),
                  _const_spec((K, E), lambda i: (0, 0)),
                  _const_spec((1, E), lambda i: (0, 0))],
        out_specs=pl.BlockSpec((tm, E), lambda i: (i, 0)),
        compiler_params=_cparams(("parallel",)),
    )(x, w, b)


def pallas_ln_qkv_heads(x, gamma, beta, w_qkv3, eps=1e-5, tm_target=512):
    """x: (M, D) f32, w_qkv3: (3*H, D, C) bf16 (q heads scaled) -> (3*H, M, C) bf16.
    Grid: (row blocks, 3*H head columns); x is fetched once per row block (column
    axis innermost, constant block index), weights streamed per head column."""
    M, D = x.shape
    JH, _, C = w_qkv3.shape
    tm = _pick_tile(M, tm_target)
    return pl.pallas_call(
        functools.partial(_ln_qkv_kernel, eps=eps),
        out_shape=jax.ShapeDtypeStruct((JH, M, C), _BF16),
        grid=(M // tm, JH),
        in_specs=[pl.BlockSpec((tm, D), lambda i, j: (i, 0)),
                  _const_spec((1, D), lambda i, j: (0, 0)),
                  _const_spec((1, D), lambda i, j: (0, 0)),
                  pl.BlockSpec((1, D, C), lambda i, j: (j, 0, 0))],
        out_specs=pl.BlockSpec((1, tm, C), lambda i, j: (j, i, 0)),
        compiler_params=_cparams(("parallel", "arbitrary")),
    )(x, gamma, beta, w_qkv3)


def pallas_flash_attention(qkv, n_visual, heads, dim_head,
                           tq_target=512, tkv_target=1024):
    """qkv: (3*H, B, Nt, C) bf16 head-major -> attn out (B, H, n_visual, C) bf16.
    Grid (B, H, q_blocks, kv_blocks); only the visual query rows are computed
    (matches the [:, :N_visual] slice)."""
    JH, B, Nt, C = qkv.shape
    H = heads
    assert JH == 3 * H and C == dim_head
    tq = _pick_tile(n_visual, tq_target)
    tkv = _pick_tile(Nt, tkv_target)
    grid = (B, H, n_visual // tq, Nt // tkv)

    cost = pl.CostEstimate(
        flops=int(4 * B * H * n_visual * Nt * C),                 # QK^T + PV
        transcendentals=int(B * H * n_visual * Nt),               # exp
        bytes_accessed=int(2 * B * H * (2 * n_visual * C
                                        + 2 * (n_visual // tq) * Nt * C)))

    return pl.pallas_call(
        _flash_attn_kernel,
        out_shape=jax.ShapeDtypeStruct((B, H, n_visual, C), _BF16),
        grid=grid,
        in_specs=[pl.BlockSpec((1, 1, tq, C), lambda b, h, qi, ki: (h, b, qi, 0)),
                  pl.BlockSpec((1, 1, tkv, C), lambda b, h, qi, ki: (H + h, b, ki, 0)),
                  pl.BlockSpec((1, 1, tkv, C), lambda b, h, qi, ki: (2 * H + h, b, ki, 0))],
        out_specs=pl.BlockSpec((1, 1, tq, C), lambda b, h, qi, ki: (b, h, qi, 0)),
        scratch_shapes=[pltpu.VMEM((tq, 1), jnp.float32),          # running max
                        pltpu.VMEM((tq, 1), jnp.float32),          # running sum
                        pltpu.VMEM((tq, C), jnp.float32)],         # acc
        compiler_params=_cparams(("parallel", "parallel", "parallel", "arbitrary")),
        cost_estimate=cost,
    )(qkv, qkv, qkv)


def pallas_epilogue(gates, attn, x, w_o3, b_o, g2, bt2,
                    w1a, b1a, w1g, b1g, w2, b2, d_ff,
                    eps=1e-5, tm_target=256, df_target=512):
    """Fused: out-projection + attn gate + residual + LN2 + GEGLU FF (d_ff-blocked)
    + dense gate + residual. attn: (B, H, Nv, C) bf16, x: (B, Nv, D) f32."""
    B, H, Nv, C = attn.shape
    D = x.shape[-1]
    tm = _pick_tile(Nv, tm_target)
    df = _pick_tile(d_ff, df_target, align=128)
    grid = (B, Nv // tm, d_ff // df)

    return pl.pallas_call(
        functools.partial(_epilogue_kernel, heads=H, eps=eps),
        out_shape=jax.ShapeDtypeStruct((B, Nv, D), x.dtype),
        grid=grid,
        in_specs=[pl.BlockSpec(memory_space=pltpu.MemorySpace.SMEM),         # gates (2,)
                  pl.BlockSpec((1, H, tm, C), lambda b, i, j: (b, 0, i, 0)), # attn
                  pl.BlockSpec((1, tm, D), lambda b, i, j: (b, i, 0)),       # x
                  _const_spec((H, C, D), lambda b, i, j: (0, 0, 0)),         # w_o
                  _const_spec((1, D), lambda b, i, j: (0, 0)),               # b_o
                  _const_spec((1, D), lambda b, i, j: (0, 0)),               # g2
                  _const_spec((1, D), lambda b, i, j: (0, 0)),               # bt2
                  pl.BlockSpec((D, df), lambda b, i, j: (0, j)),             # w_ff1 (value)
                  pl.BlockSpec((1, df), lambda b, i, j: (0, j)),             # b_ff1 (value)
                  pl.BlockSpec((D, df), lambda b, i, j: (0, j)),             # w_ff1 (gate)
                  pl.BlockSpec((1, df), lambda b, i, j: (0, j)),             # b_ff1 (gate)
                  pl.BlockSpec((df, D), lambda b, i, j: (j, 0)),             # w_ff2
                  _const_spec((1, D), lambda b, i, j: (0, 0))],              # b_ff2
        out_specs=pl.BlockSpec((1, tm, D), lambda b, i, j: (b, i, 0)),
        scratch_shapes=[pltpu.VMEM((tm, D), jnp.float32),   # y (residual stream)
                        pltpu.VMEM((tm, D), _BF16),         # LN2(y), MXU-ready
                        pltpu.VMEM((tm, D), jnp.float32)],  # FF accumulator
        compiler_params=_cparams(("parallel", "parallel", "arbitrary")),
    )(gates, attn, x, w_o3, b_o, g2, bt2, w1a, b1a, w1g, b1g, w2, b2)


# ---------------------------------------------------------------------------
# Module
# ---------------------------------------------------------------------------

class GatedSelfAttentionDensePallas:
    """Forward-only JAX/Pallas port of GatedSelfAttentionDense."""

    def __init__(self, query_dim, context_dim, n_heads, d_head,
                 alpha_attn=0.0, alpha_dense=0.0, key=None):
        self.query_dim = query_dim
        self.context_dim = context_dim
        self.heads = n_heads
        self.dim_head = d_head
        self.inner_dim = n_heads * d_head
        self.attn_scale = d_head ** -0.5
        self.d_ff = int(query_dim * 4)
        self.alpha_attn = float(alpha_attn)     # PyTorch inits these to 0.0
        self.alpha_dense = float(alpha_dense)
        self.scale = 1.0
        self.eps = 1e-5

        if key is None:
            key = jax.random.PRNGKey(0)
        ks = jax.random.split(key, 11)
        s = 0.02
        f32 = jnp.float32
        D, H, C = query_dim, n_heads, d_head
        # f32 master weights (used by the pure-JAX reference).
        self.w_lin = s * jax.random.normal(ks[0], (context_dim, D), f32)
        self.b_lin = s * jax.random.normal(ks[1], (D,), f32)
        self.w_q = s * jax.random.normal(ks[2], (D, self.inner_dim), f32)
        self.w_k = s * jax.random.normal(ks[3], (D, self.inner_dim), f32)
        self.w_v = s * jax.random.normal(ks[4], (D, self.inner_dim), f32)
        self.w_o = s * jax.random.normal(ks[5], (self.inner_dim, D), f32)
        self.b_o = s * jax.random.normal(ks[6], (D,), f32)
        self.w_ff1 = s * jax.random.normal(ks[7], (D, 2 * self.d_ff), f32)
        self.b_ff1 = s * jax.random.normal(ks[8], (2 * self.d_ff,), f32)
        self.w_ff2 = s * jax.random.normal(ks[9], (self.d_ff, D), f32)
        self.b_ff2 = s * jax.random.normal(ks[10], (D,), f32)
        self.g1 = jnp.ones((D,), f32); self.bt1 = jnp.zeros((D,), f32)
        self.g2 = jnp.ones((D,), f32); self.bt2 = jnp.zeros((D,), f32)

        # Kernel-side layouts: bf16 MXU weights, softmax scale folded into w_q,
        # head-major (3*H, D, C) qkv weight, (H, C, D) out-projection weight,
        # value/gate-split GEGLU weights, (1, E)-shaped biases / LN params.
        def _head_major(w, scale=1.0):
            return (w * scale).reshape(D, H, C).transpose(1, 0, 2)   # (H, D, C)

        self._w_lin = self.w_lin.astype(_BF16)
        self._b_lin = self.b_lin.reshape(1, -1)
        self._w_qkv3 = jnp.concatenate(
            [_head_major(self.w_q, self.attn_scale),
             _head_major(self.w_k),
             _head_major(self.w_v)], axis=0).astype(_BF16)           # (3H, D, C)
        self._w_o3 = self.w_o.reshape(H, C, D).astype(_BF16)
        self._b_o = self.b_o.reshape(1, -1)
        self._w_ff1a = self.w_ff1[:, :self.d_ff].astype(_BF16)       # value half
        self._w_ff1g = self.w_ff1[:, self.d_ff:].astype(_BF16)       # gate half
        self._b_ff1a = self.b_ff1[:self.d_ff].reshape(1, -1)
        self._b_ff1g = self.b_ff1[self.d_ff:].reshape(1, -1)
        self._w_ff2 = self.w_ff2.astype(_BF16)
        self._b_ff2 = self.b_ff2.reshape(1, -1)
        self._g1 = self.g1.reshape(1, -1); self._bt1 = self.bt1.reshape(1, -1)
        self._g2 = self.g2.reshape(1, -1); self._bt2 = self.bt2.reshape(1, -1)

    def __call__(self, x, objs, *, tm_target=512, tq_target=512,
                 tkv_target=1024, df_target=512):
        B, Nv, D = x.shape
        _, No, _ = objs.shape
        Nt = Nv + No
        H, C = self.heads, self.dim_head

        # 1) object-embedding projection (tiled matmul + bias).
        objs_p = pallas_linear(objs.reshape(B * No, self.context_dim),
                               self._w_lin, self._b_lin, tm_target=tm_target)

        # 2) concat along the token axis (single XLA pass).
        # TODO(synk): write objs_p straight into the combined buffer
        # (input_output_aliases) to remove this extra HBM round trip.
        combined = jnp.concatenate([x, objs_p.reshape(B, No, D)], axis=1)

        # 3) fused LayerNorm(norm1) + q/k/v projection, head-major output.
        qkv = pallas_ln_qkv_heads(combined.reshape(B * Nt, D), self._g1, self._bt1,
                                  self._w_qkv3, eps=self.eps, tm_target=tm_target)
        qkv = qkv.reshape(3 * H, B, Nt, C)

        # 4) flash attention (grid over batch x head x q x kv), visual queries only.
        attn = pallas_flash_attention(qkv, Nv, H, C,
                                      tq_target=tq_target, tkv_target=tkv_target)

        # 5+6) fused output projection + attn gate + residual + LN2 + GEGLU FF
        #      (d_ff-blocked) + dense gate + residual.  Gates as runtime SMEM scalars.
        gates = self.scale * jnp.tanh(
            jnp.array([self.alpha_attn, self.alpha_dense], jnp.float32))
        out = pallas_epilogue(gates, attn, x, self._w_o3, self._b_o,
                              self._g2, self._bt2,
                              self._w_ff1a, self._b_ff1a,
                              self._w_ff1g, self._b_ff1g,
                              self._w_ff2, self._b_ff2, self.d_ff,
                              eps=self.eps, tm_target=min(tm_target, 256),
                              df_target=df_target)
        return out


# ---------------------------------------------------------------------------
# Pure-JAX reference
# ---------------------------------------------------------------------------

def _layernorm_ref(x, gamma, beta, eps=1e-5):
    mu = jnp.mean(x, axis=-1, keepdims=True)
    var = jnp.mean((x - mu) ** 2, axis=-1, keepdims=True)
    return (x - mu) * jax.lax.rsqrt(var + eps) * gamma + beta


def reference_forward(mod, x, objs):
    B, Nv, D = x.shape
    H, C = mod.heads, mod.dim_head
    objs_p = objs @ mod.w_lin + mod.b_lin
    comb = jnp.concatenate([x, objs_p], axis=1)
    Nt = comb.shape[1]
    h = _layernorm_ref(comb, mod.g1, mod.bt1, mod.eps)
    q, k, v = h @ mod.w_q, h @ mod.w_k, h @ mod.w_v

    def sh(t):
        return t.reshape(B, Nt, H, C).transpose(0, 2, 1, 3).reshape(B * H, Nt, C)

    qh, kh, vh = sh(q), sh(k), sh(v)
    sim = jnp.einsum("bic,bjc->bij", qh, kh) * mod.attn_scale
    attn = jax.nn.softmax(sim, axis=-1)
    o = jnp.einsum("bij,bjc->bic", attn, vh)
    o = o.reshape(B, H, Nt, C).transpose(0, 2, 1, 3).reshape(B, Nt, H * C)
    o = o @ mod.w_o + mod.b_o
    y = x + mod.scale * math.tanh(mod.alpha_attn) * o[:, :Nv, :]
    hn = _layernorm_ref(y, mod.g2, mod.bt2, mod.eps)
    ffh = hn @ mod.w_ff1 + mod.b_ff1
    a, g = ffh[..., :mod.d_ff], ffh[..., mod.d_ff:]
    ff = (a * _gelu_tanh(g)) @ mod.w_ff2 + mod.b_ff2
    return y + mod.scale * math.tanh(mod.alpha_dense) * ff


# ---------------------------------------------------------------------------
if __name__ == "__main__":
    key = jax.random.PRNGKey(0)
    k_x, k_o, k_w = jax.random.split(key, 3)

    # Small shapes consistent with the module: 96 visual tokens + 32 grounding
    # objects, query_dim=128 (2 heads x 64), context_dim=64.
    B, Nv, No = 2, 96, 32
    query_dim, context_dim, n_heads, d_head = 128, 64, 2, 64

    x = jax.random.normal(k_x, (B, Nv, query_dim), jnp.float32)
    objs = jax.random.normal(k_o, (B, No, context_dim), jnp.float32)

    # alpha_* init to 0.0 in PyTorch (closed gates) -> use non-zero values here so the
    # attention / FF kernel outputs actually contribute and get checked.
    mod = GatedSelfAttentionDensePallas(query_dim, context_dim, n_heads, d_head,
                                        alpha_attn=0.75, alpha_dense=-0.5, key=k_w)

    # Small tile targets so every grid axis (M, Q, KV, d_ff) takes several steps even
    # at these tiny test shapes (real sizes would use the 256-1024 defaults).
    out = mod(x, objs, tm_target=64, tq_target=48, tkv_target=64, df_target=256)
    out = jax.block_until_ready(out)

    ref = reference_forward(mod, x, objs)
    assert out.shape == (B, Nv, query_dim), out.shape
    max_err = float(jnp.max(jnp.abs(out - ref)))
    assert jnp.allclose(out, ref, atol=2e-2, rtol=2e-2), max_err

    print("KERNEL_OK")
</pallas_src>

<mosaic_0001>
module attributes {stable_mosaic.version = 11 : i64} {
  func.func @_k(%arg0: i32, %arg1: memref<8x128xf32, #tpu.memory_space<vmem>>, %arg2: memref<8x128xf32, #tpu.memory_space<vmem>>) attributes {dimension_semantics = [#tpu.dimension_semantics<arbitrary>], iteration_bounds = array<i64: 2>, scalar_prefetch = 0 : i64, scratch_operands = 0 : i64, tpu.core_type = #tpu.core_type<tc>, window_params = [{pipeline_mode = #tpu.pipeline_mode<synchronous>, transform_indices = @transform_0, window_bounds = array<i64: 8, 128>}, {pipeline_mode = #tpu.pipeline_mode<synchronous>, transform_indices = @transform_1, window_bounds = array<i64: 8, 128>}]} {
    %c0 = arith.constant 0 : index
    %c0_0 = arith.constant 0 : index
    %0 = vector.load %arg1[%c0, %c0_0] : memref<8x128xf32, #tpu.memory_space<vmem>>, vector<8x128xf32>
    %cst = arith.constant 2.000000e+00 : f32
    %1 = vector.broadcast %cst : f32 to vector<8x128xf32>
    %2 = arith.mulf %0, %1 : vector<8x128xf32>
    %c0_1 = arith.constant 0 : index
    %c0_2 = arith.constant 0 : index
    %3 = vector.load %arg2[%c0_1, %c0_2] : memref<8x128xf32, #tpu.memory_space<vmem>>, vector<8x128xf32>
    tpu.vector_store %arg2[%c0_1, %c0_2], %2 {strides = array<i32>} : memref<8x128xf32, #tpu.memory_space<vmem>>, vector<8x128xf32>,
    return
  }
  func.func @transform_0(%arg0: i32) -> (i32, i32) {
    %c0_i32 = arith.constant 0 : i32
    %c0_i32_0 = arith.constant 0 : i32
    %c0_i32_1 = arith.constant 0 : i32
    return %c0_i32, %c0_i32_0 : i32, i32
  }
  func.func @transform_1(%arg0: i32) -> (i32, i32) {
    %c0_i32 = arith.constant 0 : i32
    %c0_i32_0 = arith.constant 0 : i32
    %c0_i32_1 = arith.constant 0 : i32
    return %c0_i32, %c0_i32_0 : i32, i32
  }
}

module attributes {stable_mosaic.version = 11 : i64} {
  func.func @_linear_bias_kernel(%arg0: i32, %arg1: memref<64x64xf32, #tpu.memory_space<vmem>>, %arg2: memref<64x128xbf16, #tpu.memory_space<vmem>>, %arg3: memref<1x128xf32, #tpu.memory_space<vmem>>, %arg4: memref<64x128xf32, #tpu.memory_space<vmem>>) attributes {dimension_semantics = [#tpu.dimension_semantics<parallel>], iteration_bounds = array<i64: 1>, scalar_prefetch = 0 : i64, scratch_operands = 0 : i64, tpu.core_type = #tpu.core_type<tc>, window_params = [{transform_indices = @transform_0, window_bounds = array<i64: 64, 64>}, {pipeline_mode = #tpu.pipeline_mode<synchronous>, transform_indices = @transform_1, window_bounds = array<i64: 64, 128>}, {pipeline_mode = #tpu.pipeline_mode<synchronous>, transform_indices = @transform_2, window_bounds = array<i64: 1, 128>}, {transform_indices = @transform_3, window_bounds = array<i64: 64, 128>}]} {
    %c0 = arith.constant 0 : index
    %c0_0 = arith.constant 0 : index
    %0 = vector.load %arg1[%c0, %c0_0] : memref<64x64xf32, #tpu.memory_space<vmem>>, vector<64x64xf32>
    %1 = arith.truncf %0 : vector<64x64xf32> to vector<64x64xbf16>
    %c0_1 = arith.constant 0 : index
    %c0_2 = arith.constant 0 : index
    %2 = vector.load %arg2[%c0_1, %c0_2] : memref<64x128xbf16, #tpu.memory_space<vmem>>, vector<64x128xbf16>
    %cst = arith.constant dense<0.000000e+00> : vector<64x128xf32>
    %3 = tpu.matmul %1, %2, %cst {dimension_numbers = #tpu.dot_dimension_numbers<[1], [0], [0], [1], [0, 0, 1, 1], [], []>} : vector<64x64xbf16>, vector<64x128xbf16>, vector<64x128xf32> -> vector<64x128xf32>
    %c0_3 = arith.constant 0 : index
    %c0_4 = arith.constant 0 : index
    %4 = vector.load %arg3[%c0_3, %c0_4] : memref<1x128xf32, #tpu.memory_space<vmem>>, vector<1x128xf32>
    %5 = vector.broadcast %4 : vector<1x128xf32> to vector<64x128xf32>
    %6 = arith.addf %3, %5 : vector<64x128xf32>
    %c0_5 = arith.constant 0 : index
    %c0_6 = arith.constant 0 : index
    %7 = vector.load %arg4[%c0_5, %c0_6] : memref<64x128xf32, #tpu.memory_space<vmem>>, vector<64x128xf32>
    tpu.vector_store %arg4[%c0_5, %c0_6], %6 {strides = array<i32>} : memref<64x128xf32, #tpu.memory_space<vmem>>, vector<64x128xf32>,
    return
  }
  func.func @transform_0(%arg0: i32) -> (i32, i32) {
    %c0_i32 = arith.constant 0 : i32
    %c0_i32_0 = arith.constant 0 : i32
    return %arg0, %c0_i32 : i32, i32
  }
  func.func @transform_1(%arg0: i32) -> (i32, i32) {
    %c0_i32 = arith.constant 0 : i32
    %c0_i32_0 = arith.constant 0 : i32
    %c0_i32_1 = arith.constant 0 : i32
    return %c0_i32, %c0_i32_0 : i32, i32
  }
  func.func @transform_2(%arg0: i32) -> (i32, i32) {
    %c0_i32 = arith.constant 0 : i32
    %c0_i32_0 = arith.constant 0 : i32
    %c0_i32_1 = arith.constant 0 : i32
    return %c0_i32, %c0_i32_0 : i32, i32
  }
  func.func @transform_3(%arg0: i32) -> (i32, i32) {
    %c0_i32 = arith.constant 0 : i32
    %c0_i32_0 = arith.constant 0 : i32
    return %arg0, %c0_i32 : i32, i32
  }
}

</mosaic_0001>

<bundles_post_ra>
// kernel: tpu_custom_call.1
= control target key start
LH: loop header
LB: loop body
LE: loop exit
PB: predicated region body
PF: predicated region fallthrough
CT: control target
= control target key end

     0   :  { %6 = vsyncpa [#allocation3], 0  ;;  %s341_s0 = inlined_call_operand.hbm [shape: f32[8,128], index: 0, kind: input, shape index: {}]   ;;  %s342_s1 = inlined_call_operand.hbm [shape: f32[8,128], index: 1, kind: output, shape index: {}]  }
   0x1   :  { %7 = vsyncpa [#allocation4], 0  ;;  %s262_s6 = smov 0  }
   0x2 LB: > { %s145_s7 = sadd.s32 4294967295, %s248_s6   ;;  %p146_p0 = scmp.ge.s32.totalorder %s248_s6, 1  ;;  %s248_s6 = sphi %s262_s6, %s13_s6  }
   0x3   : > { %p60_p1 = scmp.lt.s32.totalorder %s248_s6, 3  ;;  %p276_p3 = scmp.eq.s32.totalorder %s145_s7, 0 }
   0x4   : > { %s250_s10 = smov [#allocation2]   ;;  %s180_s15 = scalar_lea.hbm %s341_s0, 128 }
   0x5   : > { %p270_p2 = pnand %p146_p0, %p60_p1  ;;  %s73_s11 = sshll.u32 %s250_s10, 4  ;;  %s74_s11 = int_to_ptr.vmem [resolvable:$true] %s73_s11 }
   0x6   : > { %s347_s9 = scalar_select %p276_p3, 1, 0 }
   0x7   : > { %s346_s8 = scalar_select %p270_p2, 1, 0 }
   0x8   : > { %p162_p4 = pneg %p270_p2  ;;  %p181_p6 = scmp.ne.s32.totalorder %s341_s0, %s180_s15 }
   0x9   : > { %p187_p10 = scmp.lt.u32.totalorder %s180_s15, %s341_s0 }
   0xa   : > { %p284_p5 = pnand %p276_p3, %p162_p4 }
   0xc   : > { %p182_p7 = pneg %p284_p5 }
   0xe   : > { %p183_p8 = pnand %p182_p7, %p181_p6 }
  0x10   : > { %p184_p9 = pneg %p183_p8 }
  0x12   : > { %p189_p11 = pnand %p187_p10, %p184_p9 }
  0x14   : > { %192 = shalt.err (!%p189_p11)
}
  0x15   : > { %s193_s20 = scalar_lea.vmem %s74_s11, 128  ;;  %p201_p1 = scmp.lt.s32.totalorder %s74_s11, %s74_s11 }
  0x16   : > { %p194_p12 = scmp.ne.s32.totalorder %s74_s11, %s193_s20  ;;  %p202_p4 = scmp.lt.s32.totalorder %s193_s20, %s193_s20 }
  0x18   : > { %p196_p13 = pnand %p194_p12, %p182_p7  ;;  %p203_p3 = por %p202_p4, %p201_p1 }
  0x1a   : > { %p197_p0 = pneg %p196_p13 }
  0x1c   : > { %p204_p2 = pnand %p203_p3, %p197_p0 }
  0x1e   : > { %207 = shalt.err (!%p204_p2)
}
  0x1f   : > { %165 = dma.hbm_to_vmem [thread:$0]  (!%p284_p5), %s341_s0, 128, %s74_s11, [#allocation3]  }
  0x20   : > { %p349_p6 = scmp.ne.s32.totalorder %s346_s8, 0 }
  0x21   : > { %p350_p8 = scmp.ne.s32.totalorder (!%p349_p6), %s347_s9, 0 }
  0x22   : > { %86 = sbr.rel (%p349_p6) target bundleno = 67 (0x43), region = 24 }
  0x29   : > { %239 = dma.done.wait (%p350_p8), [#allocation3], 128  }
  0x2a   : > { %241 = vsyncadd (%p350_p8), [#allocation3], 4294967168  ;;  %s251_s23 = smov [#allocation5]   ;;  %v96_v0 = vld [vmem:[#allocation2] sm:$0xff]  ;;  %p312_p2 = scmp.eq.s32.totalorder %s145_s7, 1 }
  0x2b   : > { %s106_s24 = sshll.u32 %s251_s23, 4  ;;  %v97_v1 = vmul.f32 2.0, %v96_v0  ;;  %s107_s24 = int_to_ptr.vmem [resolvable:$true] %s106_s24 }
  0x2c   : > { %s208_s26 = scalar_lea.vmem %s107_s24, 128  ;;  %p215_p9 = scmp.lt.s32.totalorder %s107_s24, %s107_s24 }
  0x2d   : > { %98 = vst [vmem:[#allocation5] sm:$0xff] %v97_v1  ;;  %p209_p3 = scmp.ne.s32.totalorder %s107_s24, %s208_s26  ;;  %p216_p10 = scmp.lt.s32.totalorder %s208_s26, %s208_s26 }
  0x2f   : > { %p210_p5 = pnand %p209_p3, %p312_p2  ;;  %p217_p11 = por %p216_p10, %p215_p9 }
  0x31   : > { %p211_p7 = pneg %p210_p5 }
  0x33   : > { %p218_p12 = pnand %p217_p11, %p211_p7 }
  0x35   : > { %221 = shalt.err (!%p218_p12)
}
  0x36   : > { %s222_s29 = scalar_lea.hbm %s342_s1, 128 }
  0x37   : > { %p223_p13 = scmp.ne.s32.totalorder %s342_s1, %s222_s29  ;;  %p228_p4 = scmp.lt.u32.totalorder %s222_s29, %s342_s1 }
  0x39   : > { %p224_p0 = pnand %p223_p13, %p312_p2 }
  0x3b   : > { %p225_p1 = pneg %p224_p0 }
  0x3d   : > { %p230_p6 = pnand %p228_p4, %p225_p1 }
  0x3f   : > { %233 = shalt.err (!%p230_p6)
}
  0x40   : > { %159 = dma.vmem_to_hbm [thread:$0]  (%p312_p2), %s107_s24, 128, %s342_s1, [#allocation4]  }
  0x41   : > { %243 = dma.done.wait (%p312_p2), [#allocation4], 128  }
  0x42   : > { %245 = vsyncadd (%p312_p2), [#allocation4], 4294967168 }
  0x43 PF: > { %s13_s6 = sadd.s32 1, %s248_s6  }
  0x44   : > { %p10_p8 = scmp.ge.s32.totalorder %s13_s6, 4  }
  0x46   :  { %12 = sbr.rel (!%p10_p8) target bundleno = 2 (0x2), region = 53 }
  0x4d   :  { %119 = vsyncpa [#allocation3], 1 }
  0x4e   :  { %121 = vsyncpa [#allocation3 + $0x1], 1 }
  0x4f   :  { %122 = vsyncpa [#allocation4], 1 }
  0x50   :  { %124 = vsyncpa [#allocation4 + $0x1], 1 }

// kernel: tpu_custom_call.1
= control target key start
LH: loop header
LB: loop body
LE: loop exit
PB: predicated region body
PF: predicated region fallthrough
CT: control target
= control target key end

     0   :  { %8 = vsyncpa [#allocation3], 0  ;;  %s399_s0 = inlined_call_operand.hbm [shape: f32[64,64], index: 0, kind: input, shape index: {}]   ;;  %s400_s1 = inlined_call_operand.hbm [shape: bf16[64,128], index: 1, kind: input, shape index: {}]   ;;  %s401_s2 = inlined_call_operand.vmem [shape: f32[1,128], index: 2, kind: input, shape index: {}]   ;;  %s402_s3 = inlined_call_operand.hbm [shape: f32[64,128], index: 3, kind: output, shape index: {}]  }
   0x1   :  { %9 = vsyncpa [#allocation6], 0 }
   0x2   :  { %10 = vsyncpa [#allocation4], 0  ;;  %s323_s12 = smov [#allocation2]   ;;  %s251_s16 = scalar_lea.hbm %s399_s0, 1024 }
   0x3   :  { %s16_s13 = sshll.u32 %s323_s12, 4  ;;  %p252_p0 = scmp.ne.s32.totalorder %s399_s0, %s251_s16  ;;  %s17_s13 = int_to_ptr.vmem [resolvable:$true] %s16_s13 }
   0x4   :  { %p255_p1 = scmp.lt.u32.totalorder %s251_s16, %s399_s0 }
   0x6   :  { %p257_p2 = pnand %p255_p1, %p252_p0 }
   0x8   :  { %260 = shalt.err (!%p257_p2)
}
   0x9   :  { %s261_s21 = scalar_lea.vmem %s17_s13, 1024  ;;  %p266_p4 = scmp.lt.s32.totalorder %s17_s13, %s17_s13 }
   0xa   :  { %p262_p3 = scmp.ne.s32.totalorder %s17_s13, %s261_s21  ;;  %p267_p5 = scmp.lt.s32.totalorder %s261_s21, %s261_s21 }
   0xc   :  { %p268_p6 = por %p267_p5, %p266_p4 }
   0xe   :  { %p269_p7 = pnand %p268_p6, %p262_p3 }
  0x10   :  { %272 = shalt.err (!%p269_p7)
}
  0x11   :  { %s324_s22 = smov 128   ;;  %s325_s23 = smov 8  }
  0x12   :  { %22 = dma.hbm_to_vmem [thread:$0]  %s399_s0, 1024, %s17_s13, [#allocation3], %s324_s22, %s324_s22, %s325_s23  }
  0x13   :  { %s326_s26 = smov [#allocation5]   ;;  %s273_s30 = scalar_lea.hbm %s400_s1, 512 }
  0x14   :  { %s28_s27 = sshll.u32 %s326_s26, 4  ;;  %p274_p8 = scmp.ne.s32.totalorder %s400_s1, %s273_s30  ;;  %s29_s27 = int_to_ptr.vmem [resolvable:$true] %s28_s27 }
  0x15   :  { %p277_p9 = scmp.lt.u32.totalorder %s273_s30, %s400_s1 }
  0x17   :  { %p279_p10 = pnand %p277_p9, %p274_p8 }
  0x19   :  { %282 = shalt.err (!%p279_p10)
}
  0x1a   :  { %s283_s8 = scalar_lea.vmem %s29_s27, 512  ;;  %p288_p12 = scmp.lt.s32.totalorder %s29_s27, %s29_s27 }
  0x1b   :  { %p284_p11 = scmp.ne.s32.totalorder %s29_s27, %s283_s8  ;;  %p289_p13 = scmp.lt.s32.totalorder %s283_s8, %s283_s8 }
  0x1d   :  { %p290_p0 = por %p289_p13, %p288_p12 }
  0x1f   :  { %p291_p1 = pnand %p290_p0, %p284_p11 }
  0x21   :  { %294 = shalt.err (!%p291_p1)
}
  0x22   :  { %s327_s0 = smov 64   ;;  %s328_s9 = smov 4  }
  0x23   :  { %34 = dma.hbm_to_vmem [thread:$0]  %s400_s1, 512, %s29_s27, [#allocation6], %s327_s0, %s327_s0, %s328_s9  }
  0x24   :  { %317 = dma.done.wait [#allocation3], 1024  }
  0x25   :  { %318 = vsyncadd [#allocation3], 4294966272 }
  0x26   :  { %319 = dma.done.wait [#allocation6], 512  }
  0x27   :  { %320 = vsyncadd [#allocation6], 4294966784  ;;  %v247_v0 = vld [vmem:[#allocation5] sm:$0xff]   ;;  %v248_v1 = vld [vmem:[#allocation5 + $0x8] sm:$0xff]   ;;  %vm95_vm0 = vcmask 523264   ;;  %s329_s13 = smov [#allocation7]  }
  0x28   :  { %216 = vmatprep.subr.bf16.mxu0 %v247_v0  ;;  %232 = vmatprep.subr.bf16.mxu1 %v247_v0  ;;  %v249_v2 = vld [vmem:[#allocation5 + $0x10] sm:$0xff]   ;;  %v44_v3 = vld [vmem:[#allocation2] sm:$0xff]  ;;  %v45_v4 = vld [vmem:[#allocation2 + $0x8] sm:$0xff]  ;;  %s186_s14 = sshll.u32 %s329_s13, 4  ;;  %s187_s14 = int_to_ptr.vmem [resolvable:$true] %s186_s14 }
  0x29   :  { %217 = vmatpush3.bf16.msra.mxu0 %v247_v0  ;;  %236 = vmatpush3.bf16.msra.mxu1 %v247_v0  ;;  %v48_v5 = vld [vmem:[#allocation2 + $0x20] sm:$0xff]  ;;  %v52_v6 = vpack.c.bf16 %v45_v4, %v44_v3  ;;  %v49_v7 = vld [vmem:[#allocation2 + $0x28] sm:$0xff]  ;;  %v250_v9 = vld [vmem:[#allocation5 + $0x18] sm:$0xff]   ;;  %p300_p3 = scmp.lt.s32.totalorder %s187_s14, %s187_s14 }
  0x2a   :  { %218 = vmatprep.subr.bf16.mxu0 %v248_v1  ;;  %233 = vmatprep.subr.bf16.mxu1 %v248_v1  ;;  %v54_v8 = vpack.c.bf16 %v49_v7, %v48_v5  ;;  %v46_v10 = vld [vmem:[#allocation2 + $0x10] sm:$0xff]  ;;  %v47_v11 = vld [vmem:[#allocation2 + $0x18] sm:$0xff]  ;;  %v199_v16 = vld [vmem:[%s401_s2] ss:$0 sm:$0xff]  ;;  %s295_s2 = scalar_lea.vmem %s187_s14, 1024 }
  0x2b   :  { %224 = vmatprep.mubr.msk.bf16.mxu0 %vm95_vm0, %v52_v6  ;;  %v50_v12 = vld [vmem:[#allocation2 + $0x30] sm:$0xff]  ;;  %v51_v13 = vld [vmem:[#allocation2 + $0x38] sm:$0xff]  ;;  %v53_v14 = vpack.c.bf16 %v47_v11, %v46_v10  ;;  %p296_p2 = scmp.ne.s32.totalorder %s187_s14, %s295_s2  ;;  %p301_p4 = scmp.lt.s32.totalorder %s295_s2, %s295_s2 }
  0x2c   :  { %228 = vmatprep.mubr.msk.bf16.mxu1 %vm95_vm0, %v54_v8  ;;  %v55_v15 = vpack.c.bf16 %v51_v13, %v50_v12 }
  0x2d   :  { %219 = vmatpush3.bf16.msra.mxu0 %v248_v1  ;;  %237 = vmatpush3.bf16.msra.mxu1 %v248_v1  ;;  %p302_p5 = por %p301_p4, %p300_p3 }
  0x2e   :  { %220 = vmatprep.subr.bf16.mxu0 %v249_v2  ;;  %234 = vmatprep.subr.bf16.mxu1 %v249_v2 }
  0x2f   :  { %p303_p6 = pnand %p302_p5, %p296_p2 }
  0x31   :  { %221 = vmatpush3.bf16.msra.mxu0 %v249_v2  ;;  %238 = vmatpush3.bf16.msra.mxu1 %v249_v2 }
  0x32   :  { %222 = vmatprep.subr.bf16.mxu0 %v250_v9  ;;  %235 = vmatprep.subr.bf16.mxu1 %v250_v9 }
  0x35   :  { %223 = vmatpush3.bf16.msra.mxu0 %v250_v9  ;;  %239 = vmatpush3.bf16.msra.mxu1 %v250_v9 }
  0x38   :  { %225 = vmatmul.mubr.msk.bf16.vlgmr.msra.gmra.mrb[0].mxu0 %vm95_vm0, %v53_v14  ;;  %229 = vmatmul.mubr.msk.bf16.vlgmr.msra.gmra.mrb[0].mxu1 %vm95_vm0, %v55_v15 }
 0x10b   :  { %v226_v17 = vpop.f32.mrb[0].mxu0  ;;  %v230_v18 = vpop.f32.mrb[0].mxu1 }
 0x10c   :  { %v151_v19 = vadd.f32 %v226_v17, %v199_v16  ;;  %v167_v20 = vadd.f32 %v230_v18, %v199_v16  ;;  %v142_v21 = vpop.f32.mrb[1].mxu0  ;;  %v158_v22 = vpop.f32.mrb[1].mxu1 }
 0x10d   :  { %v143_v23 = vadd.f32 %v199_v16, %v142_v21  ;;  %v159_v24 = vadd.f32 %v199_v16, %v158_v22  ;;  %v227_v25 = vpop.f32.mrb[2].mxu0  ;;  %v231_v26 = vpop.f32.mrb[2].mxu1 }
 0x10e   :  { %175 = vst [vmem:[#allocation7 + $0x10] sm:$0xff] %v151_v19  ;;  %179 = vst [vmem:[#allocation7 + $0x30] sm:$0xff] %v167_v20  ;;  %v154_v27 = vadd.f32 %v227_v25, %v199_v16  ;;  %v170_v28 = vadd.f32 %v231_v26, %v199_v16  ;;  %v145_v29 = vpop.f32.mrb[3].mxu0  ;;  %v161_v30 = vpop.f32.mrb[3].mxu1 }
 0x10f   :  { %173 = vst [vmem:[#allocation7] sm:$0xff] %v143_v23  ;;  %177 = vst [vmem:[#allocation7 + $0x20] sm:$0xff] %v159_v24  ;;  %v146_v31 = vadd.f32 %v199_v16, %v145_v29  ;;  %v162_v32 = vadd.f32 %v199_v16, %v161_v30 }
 0x110   :  { %176 = vst [vmem:[#allocation7 + $0x18] sm:$0xff] %v154_v27  ;;  %180 = vst [vmem:[#allocation7 + $0x38] sm:$0xff] %v170_v28 }
 0x111   :  { %174 = vst [vmem:[#allocation7 + $0x8] sm:$0xff] %v146_v31  ;;  %178 = vst [vmem:[#allocation7 + $0x28] sm:$0xff] %v162_v32 }
 0x112   :  { %306 = shalt.err (!%p303_p6)
}
 0x113   :  { %s307_s17 = scalar_lea.hbm %s402_s3, 1024 }
 0x114   :  { %p308_p7 = scmp.ne.s32.totalorder %s402_s3, %s307_s17  ;;  %p311_p8 = scmp.lt.u32.totalorder %s307_s17, %s402_s3 }
 0x116   :  { %p313_p9 = pnand %p311_p8, %p308_p7 }
 0x118   :  { %316 = shalt.err (!%p313_p9)
}
 0x119   :  { %192 = dma.vmem_to_hbm [thread:$0]  %s187_s14, 1024, %s402_s3, [#allocation4], %s324_s22, %s324_s22, %s325_s23  }
 0x11a   :  { %321 = dma.done.wait [#allocation4], 1024  }
 0x11b   :  { %322 = vsyncadd [#allocation4], 4294966272 }
 0x11c   :  { %196 = vsyncpa [#allocation3], 1 }
 0x11d   :  { %197 = vsyncpa [#allocation6], 1 }
 0x11e   :  { %198 = vsyncpa [#allocation4], 1 }

</bundles_post_ra>
